<compile_context>
chip_gen: v5e
topology: v5e:2x2
jax: 0.10.0
libtpu: 0.0.40
codegen_flags: <defaults>
</compile_context>

<pallas_src>
import functools

import jax
import jax.numpy as jnp
from jax.experimental import pallas as pl
from jax.experimental.pallas import tpu as pltpu


def _round_up(x, m):
    return ((x + m - 1) // m) * m


def _rnn_kernel(ids_ref, weff_ref, whh_ref, wfc_ref, bfc_ref,
                out_ref, xproj_ref, *, seq_len, batch_p, vocab_p):
    n_rows = seq_len * batch_p

    # In-kernel embedding + input projection for all time steps in one MXU
    # matmul: one_hot(ids) @ W_eff, f32 accumulation, bf16 scratch store.
    ids = ids_ref[...]                                              # (S*Bp, 1) i32
    lane_iota = jax.lax.broadcasted_iota(jnp.int32, (n_rows, vocab_p), 1)
    one_hot = (lane_iota == ids).astype(jnp.bfloat16)               # (S*Bp, Vp)
    xproj_ref[...] = jnp.dot(
        one_hot, weff_ref[...], preferred_element_type=jnp.float32
    ).astype(jnp.bfloat16)

    whh = whh_ref[...]                                              # (Hp, Hp) bf16
    hidden_p = whh.shape[1]

    def step(t, h):
        base = pl.multiple_of(t * batch_p, batch_p)
        x_t = xproj_ref[pl.ds(base, batch_p), :].astype(jnp.float32)   # (Bp, Hp)
        pre = x_t + jnp.dot(h.astype(whh.dtype), whh,
                            preferred_element_type=jnp.float32)
        return jnp.tanh(pre)                                        # f32 carry

    h0 = jnp.zeros((batch_p, hidden_p), jnp.float32)
    h = jax.lax.fori_loop(0, seq_len, step, h0, unroll=min(8, seq_len))

    # fc on the final hidden state; lane-dense (O padded to 128) store.
    out_ref[...] = (
        jnp.dot(h.astype(wfc_ref.dtype), wfc_ref[...],
                preferred_element_type=jnp.float32)
        + bfc_ref[...]
    ).astype(out_ref.dtype)


@jax.jit
def rnn_forward(x_ids, emb_table, w_ih, w_hh, b_ih, b_hh, w_fc, b_fc):
    """x_ids: (S, B) int32 token ids.  Returns (1, B, output_dim) float32."""
    S, B = x_ids.shape
    V, E = emb_table.shape
    H = w_hh.shape[0]
    O = w_fc.shape[0]

    Bp = _round_up(max(B, 8), 8)        # f32 sublane multiple
    Vp = _round_up(V, 128)              # lane multiples
    Hp = _round_up(H, 128)
    Op = _round_up(O, 128)              # lane-dense output store

    # Fold embedding + input projection + both RNN biases into one table:
    #   x_proj[t, b] = emb_table[id] @ W_ih^T + b_ih + b_hh = W_eff[id]
    w_eff = emb_table @ w_ih.T + (b_ih + b_hh)[None, :]              # (V, H) f32
    w_eff_p = (jnp.zeros((Vp, Hp), jnp.float32)
               .at[:V, :H].set(w_eff).astype(jnp.bfloat16))
    whh_t = (jnp.zeros((Hp, Hp), jnp.float32)
             .at[:H, :H].set(w_hh.T).astype(jnp.bfloat16))
    wfc_t = (jnp.zeros((Hp, Op), jnp.float32)
             .at[:H, :O].set(w_fc.T).astype(jnp.bfloat16))
    bfc = jnp.zeros((1, Op), jnp.float32).at[0, :O].set(b_fc)

    # Token ids, batch-padded with 0 (padded rows never touch real rows and
    # are sliced off at the end), flattened time-major: row = t*Bp + b.
    ids_p = (jnp.zeros((S, Bp), jnp.int32)
             .at[:, :B].set(x_ids).reshape(S * Bp, 1))

    # Resident VMEM bytes (all operands + output + bf16 projection scratch).
    resident_bytes = (S * Bp * 4          # ids
                      + Vp * Hp * 2       # W_eff
                      + Hp * Hp * 2       # W_hh^T
                      + Hp * Op * 2       # W_fc^T
                      + Op * 4            # b_fc
                      + Bp * Op * 4       # out
                      + S * Bp * Hp * 2)  # x_proj scratch (bf16)
    vmem_limit = int(min(100 * 1024 * 1024,
                         max(2 * resident_bytes + (2 << 20), 16 << 20)))

    cost = pl.CostEstimate(
        flops=2 * S * Bp * Vp * Hp + 2 * S * Bp * Hp * Hp + 2 * Bp * Hp * Op,
        transcendentals=S * Bp * Hp,
        bytes_accessed=resident_bytes,
    )

    kernel = functools.partial(_rnn_kernel, seq_len=S, batch_p=Bp, vocab_p=Vp)

    out_p = pl.pallas_call(
        kernel,
        out_shape=jax.ShapeDtypeStruct((Bp, Op), jnp.float32),
        in_specs=[pl.BlockSpec(memory_space=pltpu.MemorySpace.VMEM)
                  for _ in range(5)],
        out_specs=pl.BlockSpec(memory_space=pltpu.MemorySpace.VMEM),
        scratch_shapes=[pltpu.VMEM((S * Bp, Hp), jnp.bfloat16)],
        compiler_params=pltpu.CompilerParams(vmem_limit_bytes=vmem_limit),
        cost_estimate=cost,
    )(ids_p, w_eff_p, whh_t, wfc_t, bfc)

    # PyTorch: hidden is (1, B, H) -> fc(hidden) is (1, B, O).
    return out_p[:B, :O][None, :, :]


def reference_forward(x_ids, emb_table, w_ih, w_hh, b_ih, b_hh, w_fc, b_fc):
    """Pure-JAX reference matching PyTorch nn.RNN(tanh) + nn.Linear semantics,
    with the same bf16-operand / f32-accumulate numerics as the kernel."""
    S, B = x_ids.shape
    H = w_hh.shape[0]
    # Same exact fold as the kernel (one-hot selection == row gather).
    w_eff = (emb_table @ w_ih.T + (b_ih + b_hh)[None, :]).astype(jnp.bfloat16)
    whh_t = w_hh.T.astype(jnp.bfloat16)
    wfc_t = w_fc.T.astype(jnp.bfloat16)
    x_proj = w_eff[x_ids].astype(jnp.float32)                        # (S, B, H)
    h = jnp.zeros((B, H), jnp.float32)
    for t in range(S):
        pre = x_proj[t] + jnp.dot(h.astype(jnp.bfloat16), whh_t,
                                  preferred_element_type=jnp.float32)
        h = jnp.tanh(pre)
    out = jnp.dot(h.astype(jnp.bfloat16), wfc_t,
                  preferred_element_type=jnp.float32) + b_fc
    return out[None, :, :]


if __name__ == "__main__":
    # Module hyperparameters (small, consistent with the forward pass).
    input_dim = 10       # vocab size for the (implied) nn.Embedding
    embedding_dim = 16
    hidden_dim = 32
    output_dim = 4
    seq_len = 8
    batch = 2

    key = jax.random.PRNGKey(0)
    keys = jax.random.split(key, 8)

    # Deterministic parameter init (uniform, PyTorch-style scale 1/sqrt(H)).
    k = 1.0 / jnp.sqrt(jnp.float32(hidden_dim))
    emb_table = jax.random.normal(keys[0], (input_dim, embedding_dim), jnp.float32)
    w_ih = jax.random.uniform(keys[1], (hidden_dim, embedding_dim), jnp.float32, -k, k)
    w_hh = jax.random.uniform(keys[2], (hidden_dim, hidden_dim), jnp.float32, -k, k)
    b_ih = jax.random.uniform(keys[3], (hidden_dim,), jnp.float32, -k, k)
    b_hh = jax.random.uniform(keys[4], (hidden_dim,), jnp.float32, -k, k)
    w_fc = jax.random.uniform(keys[5], (output_dim, hidden_dim), jnp.float32, -k, k)
    b_fc = jax.random.uniform(keys[6], (output_dim,), jnp.float32, -k, k)

    # Input token ids (seq_len, batch), int32 (PyTorch nn.RNN is time-major).
    x_ids = jax.random.randint(keys[7], (seq_len, batch), 0, input_dim, jnp.int32)

    out = rnn_forward(x_ids, emb_table, w_ih, w_hh, b_ih, b_hh, w_fc, b_fc)
    out = jax.block_until_ready(out)

    ref = reference_forward(x_ids, emb_table, w_ih, w_hh, b_ih, b_hh, w_fc, b_fc)
    assert out.shape == (1, batch, output_dim)
    assert jnp.allclose(out, ref, atol=1e-3, rtol=1e-3), "mismatch vs reference"

    print("KERNEL_OK")
</pallas_src>

<mosaic_0001>
module attributes {stable_mosaic.version = 11 : i64} {
  func.func @_rnn_kernel(%arg0: memref<64x1xi32, #tpu.memory_space<vmem>>, %arg1: memref<128x128xbf16, #tpu.memory_space<vmem>>, %arg2: memref<128x128xbf16, #tpu.memory_space<vmem>>, %arg3: memref<128x128xbf16, #tpu.memory_space<vmem>>, %arg4: memref<1x128xf32, #tpu.memory_space<vmem>>, %arg5: memref<8x128xf32, #tpu.memory_space<vmem>>, %arg6: memref<64x128xbf16, #tpu.memory_space<vmem>>) attributes {dimension_semantics = [], scalar_prefetch = 0 : i64, scratch_operands = 1 : i64, tpu.core_type = #tpu.core_type<tc>} {
    %c0 = arith.constant 0 : index
    %c0_0 = arith.constant 0 : index
    %0 = vector.load %arg0[%c0, %c0_0] : memref<64x1xi32, #tpu.memory_space<vmem>>, vector<64x1xi32>
    %1 = tpu.iota {dimensions = array<i32: 1>} : vector<64x128xi32>
    %2 = vector.broadcast %0 : vector<64x1xi32> to vector<64x128xi32>
    %3 = arith.cmpi eq, %1, %2 : vector<64x128xi32>
    %4 = arith.extui %3 : vector<64x128xi1> to vector<64x128xi32>
    %5 = arith.sitofp %4 : vector<64x128xi32> to vector<64x128xf32>
    %6 = arith.truncf %5 : vector<64x128xf32> to vector<64x128xbf16>
    %c0_1 = arith.constant 0 : index
    %c0_2 = arith.constant 0 : index
    %7 = vector.load %arg1[%c0_1, %c0_2] : memref<128x128xbf16, #tpu.memory_space<vmem>>, vector<128x128xbf16>
    %cst = arith.constant dense<0.000000e+00> : vector<64x128xf32>
    %8 = tpu.matmul %6, %7, %cst {dimension_numbers = #tpu.dot_dimension_numbers<[1], [0], [0], [1], [0, 0, 1, 1], [], []>} : vector<64x128xbf16>, vector<128x128xbf16>, vector<64x128xf32> -> vector<64x128xf32>
    %9 = arith.truncf %8 : vector<64x128xf32> to vector<64x128xbf16>
    %c0_3 = arith.constant 0 : index
    %c0_4 = arith.constant 0 : index
    %10 = vector.load %arg6[%c0_3, %c0_4] : memref<64x128xbf16, #tpu.memory_space<vmem>>, vector<64x128xbf16>
    tpu.vector_store %arg6[%c0_3, %c0_4], %9 {strides = array<i32>} : memref<64x128xbf16, #tpu.memory_space<vmem>>, vector<64x128xbf16>,
    %c0_5 = arith.constant 0 : index
    %c0_6 = arith.constant 0 : index
    %11 = vector.load %arg2[%c0_5, %c0_6] : memref<128x128xbf16, #tpu.memory_space<vmem>>, vector<128x128xbf16>
    %cst_7 = arith.constant 0.000000e+00 : f32
    %12 = vector.broadcast %cst_7 : f32 to vector<8x128xf32>
    %c0_i32 = arith.constant 0 : i32
    %c8_i32 = arith.constant 8 : i32
    %13 = arith.muli %c0_i32, %c8_i32 : i32
    %14 = tpu.assume_multiple %13, 8 : i32
    %15 = arith.index_cast %14 : i32 to index
    %c0_8 = arith.constant 0 : index
    %16 = vector.load %arg6[%15, %c0_8] : memref<64x128xbf16, #tpu.memory_space<vmem>>, vector<8x128xbf16>
    %17 = arith.extf %16 : vector<8x128xbf16> to vector<8x128xf32>
    %18 = arith.truncf %12 : vector<8x128xf32> to vector<8x128xbf16>
    %cst_9 = arith.constant dense<0.000000e+00> : vector<8x128xf32>
    %19 = tpu.matmul %18, %11, %cst_9 {dimension_numbers = #tpu.dot_dimension_numbers<[1], [0], [0], [1], [0, 0, 1, 1], [], []>} : vector<8x128xbf16>, vector<128x128xbf16>, vector<8x128xf32> -> vector<8x128xf32>
    %20 = arith.addf %17, %19 : vector<8x128xf32>
    %21 = math.tanh %20 : vector<8x128xf32>
    %c1_i32 = arith.constant 1 : i32
    %c8_i32_10 = arith.constant 8 : i32
    %22 = arith.muli %c1_i32, %c8_i32_10 : i32
    %23 = tpu.assume_multiple %22, 8 : i32
    %24 = arith.index_cast %23 : i32 to index
    %c0_11 = arith.constant 0 : index
    %25 = vector.load %arg6[%24, %c0_11] : memref<64x128xbf16, #tpu.memory_space<vmem>>, vector<8x128xbf16>
    %26 = arith.extf %25 : vector<8x128xbf16> to vector<8x128xf32>
    %27 = arith.truncf %21 : vector<8x128xf32> to vector<8x128xbf16>
    %cst_12 = arith.constant dense<0.000000e+00> : vector<8x128xf32>
    %28 = tpu.matmul %27, %11, %cst_12 {dimension_numbers = #tpu.dot_dimension_numbers<[1], [0], [0], [1], [0, 0, 1, 1], [], []>} : vector<8x128xbf16>, vector<128x128xbf16>, vector<8x128xf32> -> vector<8x128xf32>
    %29 = arith.addf %26, %28 : vector<8x128xf32>
    %30 = math.tanh %29 : vector<8x128xf32>
    %c2_i32 = arith.constant 2 : i32
    %c8_i32_13 = arith.constant 8 : i32
    %31 = arith.muli %c2_i32, %c8_i32_13 : i32
    %32 = tpu.assume_multiple %31, 8 : i32
    %33 = arith.index_cast %32 : i32 to index
    %c0_14 = arith.constant 0 : index
    %34 = vector.load %arg6[%33, %c0_14] : memref<64x128xbf16, #tpu.memory_space<vmem>>, vector<8x128xbf16>
    %35 = arith.extf %34 : vector<8x128xbf16> to vector<8x128xf32>
    %36 = arith.truncf %30 : vector<8x128xf32> to vector<8x128xbf16>
    %cst_15 = arith.constant dense<0.000000e+00> : vector<8x128xf32>
    %37 = tpu.matmul %36, %11, %cst_15 {dimension_numbers = #tpu.dot_dimension_numbers<[1], [0], [0], [1], [0, 0, 1, 1], [], []>} : vector<8x128xbf16>, vector<128x128xbf16>, vector<8x128xf32> -> vector<8x128xf32>
    %38 = arith.addf %35, %37 : vector<8x128xf32>
    %39 = math.tanh %38 : vector<8x128xf32>
    %c3_i32 = arith.constant 3 : i32
    %c8_i32_16 = arith.constant 8 : i32
    %40 = arith.muli %c3_i32, %c8_i32_16 : i32
    %41 = tpu.assume_multiple %40, 8 : i32
    %42 = arith.index_cast %41 : i32 to index
    %c0_17 = arith.constant 0 : index
    %43 = vector.load %arg6[%42, %c0_17] : memref<64x128xbf16, #tpu.memory_space<vmem>>, vector<8x128xbf16>
    %44 = arith.extf %43 : vector<8x128xbf16> to vector<8x128xf32>
    %45 = arith.truncf %39 : vector<8x128xf32> to vector<8x128xbf16>
    %cst_18 = arith.constant dense<0.000000e+00> : vector<8x128xf32>
    %46 = tpu.matmul %45, %11, %cst_18 {dimension_numbers = #tpu.dot_dimension_numbers<[1], [0], [0], [1], [0, 0, 1, 1], [], []>} : vector<8x128xbf16>, vector<128x128xbf16>, vector<8x128xf32> -> vector<8x128xf32>
    %47 = arith.addf %44, %46 : vector<8x128xf32>
    %48 = math.tanh %47 : vector<8x128xf32>
    %c4_i32 = arith.constant 4 : i32
    %c8_i32_19 = arith.constant 8 : i32
    %49 = arith.muli %c4_i32, %c8_i32_19 : i32
    %50 = tpu.assume_multiple %49, 8 : i32
    %51 = arith.index_cast %50 : i32 to index
    %c0_20 = arith.constant 0 : index
    %52 = vector.load %arg6[%51, %c0_20] : memref<64x128xbf16, #tpu.memory_space<vmem>>, vector<8x128xbf16>
    %53 = arith.extf %52 : vector<8x128xbf16> to vector<8x128xf32>
    %54 = arith.truncf %48 : vector<8x128xf32> to vector<8x128xbf16>
    %cst_21 = arith.constant dense<0.000000e+00> : vector<8x128xf32>
    %55 = tpu.matmul %54, %11, %cst_21 {dimension_numbers = #tpu.dot_dimension_numbers<[1], [0], [0], [1], [0, 0, 1, 1], [], []>} : vector<8x128xbf16>, vector<128x128xbf16>, vector<8x128xf32> -> vector<8x128xf32>
    %56 = arith.addf %53, %55 : vector<8x128xf32>
    %57 = math.tanh %56 : vector<8x128xf32>
    %c5_i32 = arith.constant 5 : i32
    %c8_i32_22 = arith.constant 8 : i32
    %58 = arith.muli %c5_i32, %c8_i32_22 : i32
    %59 = tpu.assume_multiple %58, 8 : i32
    %60 = arith.index_cast %59 : i32 to index
    %c0_23 = arith.constant 0 : index
    %61 = vector.load %arg6[%60, %c0_23] : memref<64x128xbf16, #tpu.memory_space<vmem>>, vector<8x128xbf16>
    %62 = arith.extf %61 : vector<8x128xbf16> to vector<8x128xf32>
    %63 = arith.truncf %57 : vector<8x128xf32> to vector<8x128xbf16>
    %cst_24 = arith.constant dense<0.000000e+00> : vector<8x128xf32>
    %64 = tpu.matmul %63, %11, %cst_24 {dimension_numbers = #tpu.dot_dimension_numbers<[1], [0], [0], [1], [0, 0, 1, 1], [], []>} : vector<8x128xbf16>, vector<128x128xbf16>, vector<8x128xf32> -> vector<8x128xf32>
    %65 = arith.addf %62, %64 : vector<8x128xf32>
    %66 = math.tanh %65 : vector<8x128xf32>
    %c6_i32 = arith.constant 6 : i32
    %c8_i32_25 = arith.constant 8 : i32
    %67 = arith.muli %c6_i32, %c8_i32_25 : i32
    %68 = tpu.assume_multiple %67, 8 : i32
    %69 = arith.index_cast %68 : i32 to index
    %c0_26 = arith.constant 0 : index
    %70 = vector.load %arg6[%69, %c0_26] : memref<64x128xbf16, #tpu.memory_space<vmem>>, vector<8x128xbf16>
    %71 = arith.extf %70 : vector<8x128xbf16> to vector<8x128xf32>
    %72 = arith.truncf %66 : vector<8x128xf32> to vector<8x128xbf16>
    %cst_27 = arith.constant dense<0.000000e+00> : vector<8x128xf32>
    %73 = tpu.matmul %72, %11, %cst_27 {dimension_numbers = #tpu.dot_dimension_numbers<[1], [0], [0], [1], [0, 0, 1, 1], [], []>} : vector<8x128xbf16>, vector<128x128xbf16>, vector<8x128xf32> -> vector<8x128xf32>
    %74 = arith.addf %71, %73 : vector<8x128xf32>
    %75 = math.tanh %74 : vector<8x128xf32>
    %c7_i32 = arith.constant 7 : i32
    %c8_i32_28 = arith.constant 8 : i32
    %76 = arith.muli %c7_i32, %c8_i32_28 : i32
    %77 = tpu.assume_multiple %76, 8 : i32
    %78 = arith.index_cast %77 : i32 to index
    %c0_29 = arith.constant 0 : index
    %79 = vector.load %arg6[%78, %c0_29] : memref<64x128xbf16, #tpu.memory_space<vmem>>, vector<8x128xbf16>
    %80 = arith.extf %79 : vector<8x128xbf16> to vector<8x128xf32>
    %81 = arith.truncf %75 : vector<8x128xf32> to vector<8x128xbf16>
    %cst_30 = arith.constant dense<0.000000e+00> : vector<8x128xf32>
    %82 = tpu.matmul %81, %11, %cst_30 {dimension_numbers = #tpu.dot_dimension_numbers<[1], [0], [0], [1], [0, 0, 1, 1], [], []>} : vector<8x128xbf16>, vector<128x128xbf16>, vector<8x128xf32> -> vector<8x128xf32>
    %83 = arith.addf %80, %82 : vector<8x128xf32>
    %84 = math.tanh %83 : vector<8x128xf32>
    %c8_i32_31 = arith.constant 8 : i32
    %85 = arith.truncf %84 : vector<8x128xf32> to vector<8x128xbf16>
    %c0_32 = arith.constant 0 : index
    %c0_33 = arith.constant 0 : index
    %86 = vector.load %arg3[%c0_32, %c0_33] : memref<128x128xbf16, #tpu.memory_space<vmem>>, vector<128x128xbf16>
    %cst_34 = arith.constant dense<0.000000e+00> : vector<8x128xf32>
    %87 = tpu.matmul %85, %86, %cst_34 {dimension_numbers = #tpu.dot_dimension_numbers<[1], [0], [0], [1], [0, 0, 1, 1], [], []>} : vector<8x128xbf16>, vector<128x128xbf16>, vector<8x128xf32> -> vector<8x128xf32>
    %c0_35 = arith.constant 0 : index
    %c0_36 = arith.constant 0 : index
    %88 = vector.load %arg4[%c0_35, %c0_36] : memref<1x128xf32, #tpu.memory_space<vmem>>, vector<1x128xf32>
    %89 = vector.broadcast %88 : vector<1x128xf32> to vector<8x128xf32>
    %90 = arith.addf %87, %89 : vector<8x128xf32>
    %c0_37 = arith.constant 0 : index
    %c0_38 = arith.constant 0 : index
    %91 = vector.load %arg5[%c0_37, %c0_38] : memref<8x128xf32, #tpu.memory_space<vmem>>, vector<8x128xf32>
    tpu.vector_store %arg5[%c0_37, %c0_38], %90 {strides = array<i32>} : memref<8x128xf32, #tpu.memory_space<vmem>>, vector<8x128xf32>,
    return
  }
}

</mosaic_0001>

<bundles_post_ra>
// kernel: rnn_forward.1
= control target key start
LH: loop header
LB: loop body
LE: loop exit
PB: predicated region body
PF: predicated region fallthrough
CT: control target
= control target key end

     0   :  { %v674_v0 = vmov 0   ;;  %v29_v26 = vlaneseq  ;;  %v675_v30 = vmov 1.0|1.0   ;;  %s892_s0 = inlined_call_operand.vmem [shape: s32[64,1], index: 0, kind: input, shape index: {}]   ;;  %s893_s1 = inlined_call_operand.vmem [shape: bf16[128,128], index: 1, kind: input, shape index: {}]   ;;  %s894_s2 = inlined_call_operand.vmem [shape: bf16[128,128], index: 2, kind: input, shape index: {}]   ;;  %s895_s3 = inlined_call_operand.vmem [shape: bf16[128,128], index: 3, kind: input, shape index: {}]   ;;  %s896_s4 = inlined_call_operand.vmem [shape: f32[1,128], index: 4, kind: input, shape index: {}]   ;;  %s897_s5 = inlined_call_operand.vmem [shape: f32[8,128], index: 5, kind: output, shape index: {}]  }
   0x1   :  { %655 = vset.pattern.permute.xlu1 %v674_v0  ;;  %654 = vset.pattern.permute.xlu0 %v674_v0  ;;  %v23_v1 = vld [vmem:[%s892_s0 + $0x10] sm:$0xff]  ;;  %v21_v2 = vld [vmem:[%s892_s0] sm:$0xff]  ;;  %v612_v4 = vld [vmem:[%s893_s1 + $0x38] sm:$0xff] }
   0x2   :  { %38 = vperm.xlu1 %655, %v23_v1   ;;  %32 = vperm.xlu0 %654, %v21_v2   ;;  %v25_v3 = vld [vmem:[%s892_s0 + $0x20] sm:$0xff]  ;;  %v611_v5 = vld [vmem:[%s893_s1 + $0x30] sm:$0xff]  ;;  %v727_v6 = vld [vmem:[%s894_s2 + $0x38] sm:$0xff]  ;;  %v30_v27 = vand.u32 127, %v29_v26 }
   0x3   :  { %656 = vset.pattern.permute.xlu2 %v674_v0  ;;  %147 = vmatpush.bf16.msra.mxu0 %v612_v4  ;;  %v24_v7 = vld [vmem:[%s892_s0 + $0x18] sm:$0xff]  ;;  %v22_v8 = vld [vmem:[%s892_s0 + $0x8] sm:$0xff]  ;;  %v739_v9 = vld [vmem:[%s894_s2 + $0x30] sm:$0xff] }
   0x4   :  { %44 = vperm.xlu2 %656, %v25_v3   ;;  %258 = vmatpush.bf16.msra.mxu1 %v727_v6  ;;  %v26_v10 = vld [vmem:[%s892_s0 + $0x28] sm:$0xff]  ;;  %v609_v13 = vld [vmem:[%s893_s1 + $0x20] sm:$0xff]  ;;  %v28_v14 = vld [vmem:[%s892_s0 + $0x38] sm:$0xff] }
   0x5   :  { %277 = vmatpush.bf16.msra.mxu2 %v727_v6  ;;  %296 = vmatpush.bf16.msra.mxu3 %v727_v6  ;;  %v610_v11 = vld [vmem:[%s893_s1 + $0x28] sm:$0xff]  ;;  %v27_v15 = vld [vmem:[%s892_s0 + $0x30] sm:$0xff]  ;;  %v608_v16 = vld [vmem:[%s893_s1 + $0x18] sm:$0xff] }
   0x6   :  { %v753_v12 = vld [vmem:[%s894_s2 + $0x28] sm:$0xff]  ;;  %v607_v17 = vld [vmem:[%s893_s1 + $0x10] sm:$0xff]  ;;  %v781_v19 = vld [vmem:[%s894_s2 + $0x20] sm:$0xff] }
   0x7   :  { %148 = vmatpush.bf16.msra.mxu0 %v611_v5  ;;  %v606_v18 = vld [vmem:[%s893_s1 + $0x8] sm:$0xff]  ;;  %v605_v20 = vld [vmem:[%s893_s1] sm:$0xff]  ;;  %v790_v21 = vld [vmem:[%s894_s2 + $0x18] sm:$0xff] }
   0x8   :  { %259 = vmatpush.bf16.msra.mxu1 %v739_v9  ;;  %v801_v22 = vld [vmem:[%s894_s2 + $0x10] sm:$0xff]  ;;  %v807_v23 = vld [vmem:[%s894_s2 + $0x8] sm:$0xff]  ;;  %v817_v24 = vld [vmem:[%s894_s2] sm:$0xff] }
   0x9   :  { %278 = vmatpush.bf16.msra.mxu2 %v739_v9  ;;  %297 = vmatpush.bf16.msra.mxu3 %v739_v9  ;;  %v625_v26 = vld [vmem:[%s895_s3 + $0x20] sm:$0xff] }
   0xa   :  { %41 = vperm.xlu1 %655, %v24_v7   ;;  %35 = vperm.xlu0 %654, %v22_v8  }
   0xb   :  { %149 = vmatpush.bf16.msra.mxu0 %v610_v11 }
   0xc   :  { %47 = vperm.xlu2 %656, %v26_v10   ;;  %260 = vmatpush.bf16.msra.mxu1 %v753_v12 }
   0xd   :  { %279 = vmatpush.bf16.msra.mxu2 %v753_v12  ;;  %298 = vmatpush.bf16.msra.mxu3 %v753_v12 }
   0xf   :  { %150 = vmatpush.bf16.msra.mxu0 %v609_v13 }
  0x10   :  { %261 = vmatpush.bf16.msra.mxu1 %v781_v19 }
  0x11   :  { %280 = vmatpush.bf16.msra.mxu2 %v781_v19  ;;  %299 = vmatpush.bf16.msra.mxu3 %v781_v19 }
  0x12   :  { %53 = vperm.xlu1 %655, %v28_v14   ;;  %50 = vperm.xlu0 %654, %v27_v15  }
  0x13   :  { %151 = vmatpush.bf16.msra.mxu0 %v608_v16 }
  0x14   :  { %262 = vmatpush.bf16.msra.mxu1 %v790_v21 }
  0x15   :  { %281 = vmatpush.bf16.msra.mxu2 %v790_v21  ;;  %300 = vmatpush.bf16.msra.mxu3 %v790_v21 }
  0x17   :  { %152 = vmatpush.bf16.msra.mxu0 %v607_v17 }
  0x18   :  { %263 = vmatpush.bf16.msra.mxu1 %v801_v22 }
  0x19   :  { %282 = vmatpush.bf16.msra.mxu2 %v801_v22  ;;  %301 = vmatpush.bf16.msra.mxu3 %v801_v22 }
  0x1b   :  { %153 = vmatpush.bf16.msra.mxu0 %v606_v18 }
  0x1c   :  { %264 = vmatpush.bf16.msra.mxu1 %v807_v23 }
  0x1d   :  { %283 = vmatpush.bf16.msra.mxu2 %v807_v23  ;;  %302 = vmatpush.bf16.msra.mxu3 %v807_v23 }
  0x1f   :  { %154 = vmatpush.bf16.msra.mxu0 %v605_v20 }
  0x20   :  { %265 = vmatpush.bf16.msra.mxu1 %v817_v24 }
  0x21   :  { %284 = vmatpush.bf16.msra.mxu2 %v817_v24  ;;  %303 = vmatpush.bf16.msra.mxu3 %v817_v24 }
  0x23   :  { %372 = vmatpush.bf16.msrb.mxu0 %v727_v6  ;;  %266 = vmatmul.bf16.vlgmr.msra.gmra.mxu1 %v674_v0 }
  0x24   :  { %315 = vmatpush.bf16.msrb.mxu1 %v727_v6 }
  0x25   :  { %334 = vmatpush.bf16.msrb.mxu2 %v727_v6  ;;  %353 = vmatpush.bf16.msrb.mxu3 %v727_v6 }
  0x27   :  { %373 = vmatpush.bf16.msrb.mxu0 %v739_v9 }
  0x28   :  { %316 = vmatpush.bf16.msrb.mxu1 %v739_v9 }
  0x29   :  { %335 = vmatpush.bf16.msrb.mxu2 %v739_v9  ;;  %354 = vmatpush.bf16.msrb.mxu3 %v739_v9 }
  0x2b   :  { %374 = vmatpush.bf16.msrb.mxu0 %v753_v12 }
  0x2c   :  { %317 = vmatpush.bf16.msrb.mxu1 %v753_v12 }
  0x2d   :  { %336 = vmatpush.bf16.msrb.mxu2 %v753_v12  ;;  %355 = vmatpush.bf16.msrb.mxu3 %v753_v12 }
  0x2f   :  { %375 = vmatpush.bf16.msrb.mxu0 %v781_v19 }
  0x30   :  { %318 = vmatpush.bf16.msrb.mxu1 %v781_v19 }
  0x31   :  { %337 = vmatpush.bf16.msrb.mxu2 %v781_v19  ;;  %356 = vmatpush.bf16.msrb.mxu3 %v781_v19 }
  0x33   :  { %376 = vmatpush.bf16.msrb.mxu0 %v790_v21 }
  0x34   :  { %319 = vmatpush.bf16.msrb.mxu1 %v790_v21 }
  0x35   :  { %338 = vmatpush.bf16.msrb.mxu2 %v790_v21  ;;  %357 = vmatpush.bf16.msrb.mxu3 %v790_v21 }
  0x37   :  { %377 = vmatpush.bf16.msrb.mxu0 %v801_v22 }
  0x38   :  { %320 = vmatpush.bf16.msrb.mxu1 %v801_v22 }
  0x39   :  { %339 = vmatpush.bf16.msrb.mxu2 %v801_v22  ;;  %358 = vmatpush.bf16.msrb.mxu3 %v801_v22 }
  0x3b   :  { %378 = vmatpush.bf16.msrb.mxu0 %v807_v23 }
  0x3c   :  { %321 = vmatpush.bf16.msrb.mxu1 %v807_v23 }
  0x3d   :  { %340 = vmatpush.bf16.msrb.mxu2 %v807_v23  ;;  %359 = vmatpush.bf16.msrb.mxu3 %v807_v23 }
  0x3f   :  { %379 = vmatpush.bf16.msrb.mxu0 %v817_v24 }
  0x40   :  { %322 = vmatpush.bf16.msrb.mxu1 %v817_v24 }
  0x41   :  { %341 = vmatpush.bf16.msrb.mxu2 %v817_v24  ;;  %360 = vmatpush.bf16.msrb.mxu3 %v817_v24 }
  0x44   :  { %391 = vmatpush.bf16.msra.mxu1 %v727_v6 }
  0x48   :  { %392 = vmatpush.bf16.msra.mxu1 %v739_v9 }
  0x4c   :  { %393 = vmatpush.bf16.msra.mxu1 %v753_v12 }
  0x50   :  { %394 = vmatpush.bf16.msra.mxu1 %v781_v19 }
  0x54   :  { %395 = vmatpush.bf16.msra.mxu1 %v790_v21 }
  0x58   :  { %396 = vmatpush.bf16.msra.mxu1 %v801_v22 }
  0x5c   :  { %397 = vmatpush.bf16.msra.mxu1 %v807_v23  ;;  %v628_v23 = vld [vmem:[%s895_s3 + $0x38] sm:$0xff] }
  0x5e   :  { %v45_v32 = vpop.permute.xlu2 %44 }
  0x5f   :  { %vm59_vm6 = vcmp.eq.s32.totalorder %v30_v27, %v45_v32 }
  0x60   :  { %398 = vmatpush.bf16.msra.mxu1 %v817_v24  ;;  %v627_v24 = vld [vmem:[%s895_s3 + $0x30] sm:$0xff] }
  0x66   :  { %v48_v33 = vpop.permute.xlu2 %47 }
  0x67   :  { %vm60_vm7 = vcmp.eq.s32.totalorder %v30_v27, %v48_v33 }
  0x68   :  { %vm537_vm8 = vmpackc.low %vm60_vm7, %vm59_vm6 }
  0x74   :  { %v33_v25 = vpop.permute.xlu0 %32  ;;  %v39_v29 = vpop.permute.xlu1 %38 }
  0x75   :  { %vm55_vm1 = vcmp.eq.s32.totalorder %v30_v27, %v33_v25  ;;  %vm57_vm3 = vcmp.eq.s32.totalorder %v30_v27, %v39_v29  ;;  %v626_v25 = vld [vmem:[%s895_s3 + $0x28] sm:$0xff] }
  0x7c   :  { %v36_v28 = vpop.permute.xlu0 %35  ;;  %v42_v31 = vpop.permute.xlu1 %41 }
  0x7d   :  { %vm56_vm0 = vcmp.eq.s32.totalorder %v30_v27, %v36_v28  ;;  %vm58_vm4 = vcmp.eq.s32.totalorder %v30_v27, %v42_v31 }
  0x7e   :  { %vm533_vm2 = vmpackc.low %vm56_vm0, %vm55_vm1 }
  0x7f   :  { %534 = vmatmul.msk.bf16.vlgmr.msra.gmra.mxu0 %vm533_vm2, %v675_v30  ;;  %vm535_vm5 = vmpackc.low %vm58_vm4, %vm57_vm3 }
  0x84   :  { %v54_v34 = vpop.permute.xlu1 %53  ;;  %v51_v35 = vpop.permute.xlu0 %50 }
  0x85   :  { %vm62_vm9 = vcmp.eq.s32.totalorder %v30_v27, %v54_v34  ;;  %vm61_vm10 = vcmp.eq.s32.totalorder %v30_v27, %v51_v35  ;;  %v624_v27 = vld [vmem:[%s895_s3 + $0x18] sm:$0xff]  ;;  %v623_v35 = vld [vmem:[%s895_s3 + $0x10] sm:$0xff] }
  0x86   :  { %vm539_vm11 = vmpackc.low %vm62_vm9, %vm61_vm10 }
  0x8f   :  { %536 = vmatmul.msk.bf16.gmra.mxu0 %vm535_vm5, %v675_v30 }
  0x9f   :  { %538 = vmatmul.msk.bf16.gmra.mxu0 %vm537_vm8, %v675_v30 }
  0xa0   :  { %v267_v36 = vpop.f32.mrf.mxu1 }
  0xa8   :  { %v269_v37 = vpop.f32.mrf.mxu1 }
  0xa9   :  { %v621_v37 = vld [vmem:[%s895_s3] sm:$0xff] }
  0xaf   :  { %540 = vmatmul.msk.bf16.gmra.mxu0 %vm539_vm11, %v675_v30 }
  0xfc   :  { %v156_v38 = vpop.f32.mrf.mxu0 }
 0x104   :  { %v158_v39 = vpop.f32.mrf.mxu0 }
 0x105   :  { %v632_v40 = vpack.c.bf16 %v158_v39, %v156_v38 }
 0x107   :  { %633 = vst [vmem:[#allocation2] sm:$0xff] %v632_v40  }
 0x10c   :  { %v161_v41 = vpop.f32.mrf.mxu0 }
 0x10e   :  { %v208_v42 = vld [vmem:[#allocation2] sm:$0xff]  }
 0x10f   :  { %v209_v43 = vunpack.c.l.bf16 %v208_v42  ;;  %v275_v55 = vunpack.c.h.bf16 %v208_v42 }
 0x111   :  { %v271_v44 = vadd.f32 %v267_v36, %v209_v43  ;;  %v622_v36 = vld [vmem:[%s895_s3 + $0x8] sm:$0xff] }
 0x113   :  { %658 = vtanh.f32 %v271_v44 }
 0x114   :  { %v163_v45 = vpop.f32.mrf.mxu0 }
 0x115   :  { %v637_v46 = vpack.c.bf16 %v163_v45, %v161_v41  ;;  %v657_v45 = vld [vmem:[%s896_s4] ss:$0 sm:$0xff] }
 0x117   :  { %649 = vst [vmem:[#allocation2 + $0x8] sm:$0xff] %v637_v46  }
 0x119   :  { %v659_v47 = vpop.eup %658 }
 0x11a   :  { %v276_v48 = vpack.c.bf16 %v659_v47, %v659_v47 }
 0x11c   :  { %v166_v49 = vpop.f32.mrf.mxu0  ;;  %285 = vmatmul.bf16.vlgmr.msra.gmra.mxu2 %v276_v48 }
 0x11d   :  { %475 = vmatpush.bf16.msra.mxu2 %v628_v23 }
 0x11e   :  { %v293_v61 = vld [vmem:[#allocation2 + $0x8] sm:$0xff]  }
 0x11f   :  { %v294_v62 = vunpack.c.l.bf16 %v293_v61  ;;  %v313_v4 = vunpack.c.h.bf16 %v293_v61 }
 0x121   :  { %476 = vmatpush.bf16.msra.mxu2 %v627_v24 }
 0x124   :  { %v168_v50 = vpop.f32.mrf.mxu0 }
 0x125   :  { %v642_v51 = vpack.c.bf16 %v168_v50, %v166_v49  ;;  %477 = vmatpush.bf16.msra.mxu2 %v626_v25 }
 0x127   :  { %650 = vst [vmem:[#allocation2 + $0x10] sm:$0xff] %v642_v51  }
 0x129   :  { %478 = vmatpush.bf16.msra.mxu2 %v625_v26 }
 0x12c   :  { %v171_v52 = vpop.f32.mrf.mxu0 }
 0x12d   :  { %479 = vmatpush.bf16.msra.mxu2 %v624_v27 }
 0x12e   :  { %v331_v10 = vld [vmem:[#allocation2 + $0x10] sm:$0xff]  }
 0x12f   :  { %v332_v11 = vunpack.c.l.bf16 %v331_v10  ;;  %v351_v17 = vunpack.c.h.bf16 %v331_v10 }
 0x131   :  { %480 = vmatpush.bf16.msra.mxu2 %v623_v35 }
 0x134   :  { %v173_v53 = vpop.f32.mrf.mxu0 }
 0x135   :  { %v647_v54 = vpack.c.bf16 %v173_v53, %v171_v52  ;;  %481 = vmatpush.bf16.msra.mxu2 %v622_v36 }
 0x137   :  { %651 = vst [vmem:[#allocation2 + $0x18] sm:$0xff] %v647_v54  }
 0x139   :  { %482 = vmatpush.bf16.msra.mxu2 %v621_v37 }
 0x13e   :  { %v369_v28 = vld [vmem:[#allocation2 + $0x18] sm:$0xf]  ;;  %v388_v38 = vld [vmem:[#allocation2 + $0x1c] sm:$0xf] }
 0x13f   :  { %v370_v29 = vunpack.c.l.bf16 %v369_v28  ;;  %v389_v39 = vunpack.c.l.bf16 %v388_v38 }
 0x19f   :  { %v286_v56 = vpop.f32.mrf.mxu2 }
 0x1a0   :  { %v290_v57 = vadd.f32 %v286_v56, %v275_v55 }
 0x1a2   :  { %660 = vtanh.f32 %v290_v57 }
 0x1a7   :  { %v288_v58 = vpop.f32.mrf.mxu2 }
 0x1a8   :  { %v661_v59 = vpop.eup %660 }
 0x1a9   :  { %v295_v60 = vpack.c.bf16 %v661_v59, %v661_v59 }
 0x1ab   :  { %304 = vmatmul.bf16.vlgmr.msra.gmra.mxu3 %v295_v60 }
 0x22e   :  { %v305_v63 = vpop.f32.mrf.mxu3 }
 0x22f   :  { %v309_v0 = vadd.f32 %v305_v63, %v294_v62 }
 0x231   :  { %662 = vtanh.f32 %v309_v0 }
 0x236   :  { %v307_v1 = vpop.f32.mrf.mxu3 }
 0x237   :  { %v663_v2 = vpop.eup %662 }
 0x238   :  { %v314_v3 = vpack.c.bf16 %v663_v2, %v663_v2 }
 0x23a   :  { %323 = vmatmul.bf16.vlgmr.msrb.gmra.mxu1 %v314_v3 }
 0x2b7   :  { %v324_v5 = vpop.f32.mrf.mxu1 }
 0x2b8   :  { %v328_v6 = vadd.f32 %v324_v5, %v313_v4 }
 0x2ba   :  { %664 = vtanh.f32 %v328_v6 }
 0x2bf   :  { %v326_v7 = vpop.f32.mrf.mxu1 }
 0x2c0   :  { %v665_v8 = vpop.eup %664 }
 0x2c1   :  { %v333_v9 = vpack.c.bf16 %v665_v8, %v665_v8 }
 0x2c3   :  { %342 = vmatmul.bf16.vlgmr.msrb.gmra.mxu2 %v333_v9 }
 0x346   :  { %v343_v12 = vpop.f32.mrf.mxu2 }
 0x347   :  { %v347_v13 = vadd.f32 %v343_v12, %v332_v11 }
 0x349   :  { %666 = vtanh.f32 %v347_v13 }
 0x34e   :  { %v345_v14 = vpop.f32.mrf.mxu2 }
 0x34f   :  { %v667_v15 = vpop.eup %666 }
 0x350   :  { %v352_v16 = vpack.c.bf16 %v667_v15, %v667_v15 }
 0x352   :  { %361 = vmatmul.bf16.vlgmr.msrb.gmra.mxu3 %v352_v16 }
 0x3d5   :  { %v362_v18 = vpop.f32.mrf.mxu3 }
 0x3d6   :  { %v366_v19 = vadd.f32 %v362_v18, %v351_v17 }
 0x3d8   :  { %668 = vtanh.f32 %v366_v19 }
 0x3dd   :  { %v364_v20 = vpop.f32.mrf.mxu3 }
 0x3de   :  { %v669_v21 = vpop.eup %668 }
 0x3df   :  { %v371_v22 = vpack.c.bf16 %v669_v21, %v669_v21 }
 0x3e1   :  { %380 = vmatmul.bf16.vlgmr.msrb.gmra.mxu0 %v371_v22 }
 0x45e   :  { %v381_v30 = vpop.f32.mrf.mxu0 }
 0x45f   :  { %v385_v31 = vadd.f32 %v381_v30, %v370_v29 }
 0x461   :  { %670 = vtanh.f32 %v385_v31 }
 0x466   :  { %v383_v32 = vpop.f32.mrf.mxu0 }
 0x467   :  { %v671_v33 = vpop.eup %670 }
 0x468   :  { %v390_v34 = vpack.c.bf16 %v671_v33, %v671_v33 }
 0x46a   :  { %399 = vmatmul.bf16.vlgmr.msra.gmra.mxu1 %v390_v34 }
 0x4e7   :  { %v400_v40 = vpop.f32.mrf.mxu1 }
 0x4e8   :  { %v404_v41 = vadd.f32 %v400_v40, %v389_v39 }
 0x4ea   :  { %672 = vtanh.f32 %v404_v41 }
 0x4ef   :  { %v402_v42 = vpop.f32.mrf.mxu1 }
 0x4f0   :  { %v673_v43 = vpop.eup %672 }
 0x4f1   :  { %v406_v44 = vpack.c.bf16 %v673_v43, %v673_v43 }
 0x4f3   :  { %483 = vmatmul.bf16.vlgmr.msra.gmra.mxu2 %v406_v44 }
 0x576   :  { %v484_v46 = vpop.f32.mrf.mxu2 }
 0x577   :  { %v485_v47 = vadd.f32 %v657_v45, %v484_v46 }
 0x579   :  { %488 = vst [vmem:[%s897_s5] sm:$0xff] %v485_v47 }
 0x57e   :  { %v486_v48 = vpop.f32.mrf.mxu2 }

</bundles_post_ra>
